<compile_context>
chip_gen: v7x
topology: tpu7x:2x2x1
jax: 0.10.0
libtpu: 0.0.40
codegen_flags: <defaults>
</compile_context>

<pallas_src>
import functools

import jax
import jax.numpy as jnp
from jax.experimental import pallas as pl
from jax.experimental.pallas import tpu as pltpu

H1 = 512
H2 = 128
LANE = 128
K_MAX = 4096        # largest D_in chunk kept VMEM-resident per grid step
TB_MAX = 256        # batch tile (128-256 also fine on v5e; multiple of 16)


def _round_up(x, m):
    return ((x + m - 1) // m) * m


def _k_tiling(d_in):
    """Return (tk, d_pad): K-tile size over D_in and the (maybe padded) D_in."""
    if d_in <= K_MAX:
        return d_in, d_in
    for tk in (4096, 2048, 1024, 512, 256, 128):
        if d_in % tk == 0:
            return tk, d_in
    tk = 2048
    return tk, _round_up(d_in, tk)


def _vmem_cap_bytes():
    try:
        return int(pltpu.get_tpu_info().vmem_capacity_bytes)
    except Exception:
        return 64 << 20   # conservative (v7x per-TC) fallback


def _mlp_kernel(x_ref, w1_ref, b1_ref, w2_ref, b2_ref, w3_ref, b3_ref,
                o_ref, acc_ref, h1_ref):
    k = pl.program_id(1)

    @pl.when(k == 0)
    def _init():
        acc_ref[...] = jnp.zeros_like(acc_ref)

    # Layer-1 partial product for this D_in chunk. x arrives as f32; the bf16
    # cast is done here on the VPU (hidden under the MXU) so the wrapper never
    # materializes a bf16 copy of x in HBM.
    acc_ref[...] += jnp.dot(x_ref[...].astype(jnp.bfloat16), w1_ref[...],
                            preferred_element_type=jnp.float32)

    @pl.when(k == pl.num_programs(1) - 1)
    def _finish():
        # Bias + ReLU in f32 (v5e-friendly); stage h1 in VMEM as bf16 so the
        # (TB, 512) activation stays off the vreg file.
        h1_ref[...] = jnp.maximum(acc_ref[...] + b1_ref[...], 0.0).astype(jnp.bfloat16)

        # Layer 2: (TB, 512) @ (512, 128)
        h2 = jnp.dot(h1_ref[...], w2_ref[...], preferred_element_type=jnp.float32)
        h2 = jnp.maximum(h2 + b2_ref[...], 0.0).astype(jnp.bfloat16)

        # Layer 3 (logits): (TB, 128) @ (128, N_pad) -> lane-dense bf16 store.
        out = jnp.dot(h2, w3_ref[...], preferred_element_type=jnp.float32)
        o_ref[...] = (out + b3_ref[...]).astype(o_ref.dtype)


def prepare_params(w1, b1, w2, b2, w3, b3):
    """One-time conversion (call once, outside the per-step forward):
    bf16 weights, w1 zero-padded along D_in to the K tiling, w3/b3 zero-padded
    to a lane-dense multiple of 128, biases reshaped to (1, n) f32."""
    d_in = w1.shape[0]
    num_classes = w3.shape[1]
    _, d_pad = _k_tiling(d_in)
    n_pad = _round_up(max(num_classes, LANE), LANE)

    w1b = jnp.pad(w1, ((0, d_pad - d_in), (0, 0))).astype(jnp.bfloat16)
    w2b = w2.astype(jnp.bfloat16)
    w3b = jnp.pad(w3, ((0, 0), (0, n_pad - num_classes))).astype(jnp.bfloat16)
    b1r = b1.reshape(1, H1).astype(jnp.float32)
    b2r = b2.reshape(1, H2).astype(jnp.float32)
    b3r = jnp.pad(b3, ((0, n_pad - num_classes),)).reshape(1, n_pad).astype(jnp.float32)
    return w1b, b1r, w2b, b2r, w3b, b3r


@functools.partial(jax.jit, static_argnames=("num_classes",))
def mlp_classifier_forward(x_nchw, w1b, b1r, w2b, b2r, w3b, b3r, *, num_classes):
    """Forward pass. x_nchw: (B, C, H, W) f32. Returns (B, num_classes) f32 logits."""
    B = x_nchw.shape[0]
    x = x_nchw.reshape(B, -1).astype(jnp.float32)          # nn.Flatten (NCHW order)
    d_in = x.shape[1]
    tk, d_pad = _k_tiling(d_in)
    n_pad = w3b.shape[1]
    assert w1b.shape[0] == d_pad, "params were not prepared for this input size"

    if d_pad != d_in:   # only for huge D_in that is not a multiple of the K tile
        x = jnp.pad(x, ((0, 0), (0, d_pad - d_in)))

    # Batch tile: multiple of 16 (bf16 sublane packing); ragged last block.
    TB = min(TB_MAX, _round_up(B, 16))
    num_b = pl.cdiv(B, TB)
    num_k = d_pad // tk

    # VMEM budget: count 2x on every input (Pallas double-buffers by default,
    # even for constant index_maps) + the two scratch buffers.
    vmem_bytes = (
        2 * TB * tk * 4                        # x tile (f32)
        + 2 * tk * H1 * 2                      # w1 K-tile (bf16)
        + 2 * (H1 * H2 + H2 * n_pad) * 2       # w2, w3 (bf16, resident)
        + 2 * (H1 + H2 + n_pad) * 4            # biases (f32)
        + 2 * TB * n_pad * 2                   # out tile (bf16)
        + TB * H1 * 4 + TB * H1 * 2            # acc (f32) + h1 (bf16) scratch
    )
    vmem_limit = min(max(int(1.5 * vmem_bytes) + (4 << 20), 16 << 20),
                     int(0.75 * _vmem_cap_bytes()))        # gen-aware cap (v7x: 64 MiB)

    flops = 2 * B * (d_in * H1 + H1 * H2 + H2 * n_pad)
    bytes_accessed = (B * d_in * 4
                      + (d_pad * H1 + H1 * H2 + H2 * n_pad) * 2
                      + (H1 + H2 + n_pad) * 4
                      + B * n_pad * 2)
    cost = pl.CostEstimate(flops=flops, transcendentals=0,
                           bytes_accessed=bytes_accessed)

    out = pl.pallas_call(
        _mlp_kernel,
        out_shape=jax.ShapeDtypeStruct((B, n_pad), jnp.bfloat16),
        grid_spec=pltpu.PrefetchScalarGridSpec(
            num_scalar_prefetch=0,
            grid=(num_b, num_k),
            in_specs=[
                pl.BlockSpec((TB, tk), lambda i, k: (i, k)),     # x tile (streamed)
                pl.BlockSpec((tk, H1), lambda i, k: (k, 0)),     # w1 K-tile
                pl.BlockSpec((1, H1), lambda i, k: (0, 0)),      # b1 (resident)
                pl.BlockSpec((H1, H2), lambda i, k: (0, 0)),     # w2 (resident)
                pl.BlockSpec((1, H2), lambda i, k: (0, 0)),      # b2
                pl.BlockSpec((H2, n_pad), lambda i, k: (0, 0)),  # w3 (padded)
                pl.BlockSpec((1, n_pad), lambda i, k: (0, 0)),   # b3 (padded)
            ],
            out_specs=pl.BlockSpec((TB, n_pad), lambda i, k: (i, 0)),
            scratch_shapes=[pltpu.VMEM((TB, H1), jnp.float32),   # layer-1 f32 accumulator
                            pltpu.VMEM((TB, H1), jnp.bfloat16)], # h1 staging
        ),
        compiler_params=pltpu.CompilerParams(
            dimension_semantics=("parallel", "arbitrary"),
            vmem_limit_bytes=vmem_limit,
        ),
        cost_estimate=cost,
    )(x, w1b, b1r, w2b, b2r, w3b, b3r)

    # TODO(synk): logits are bf16-rounded (as are x/weights/hidden activations);
    # callers needing f32-exact PyTorch logits should use an all-f32 variant.
    return out[:, :num_classes].astype(jnp.float32)


def init_params(key, input_size, num_classes):
    """Kaiming-normal weights (fan_in, gain=sqrt(2)), zero biases; (in, out) layout."""
    k1, k2, k3 = jax.random.split(key, 3)

    def kaiming(k, fan_in, fan_out):
        std = (2.0 / fan_in) ** 0.5
        return jax.random.normal(k, (fan_in, fan_out), dtype=jnp.float32) * std

    w1 = kaiming(k1, input_size, H1)
    b1 = jnp.zeros((H1,), jnp.float32)
    w2 = kaiming(k2, H1, H2)
    b2 = jnp.zeros((H2,), jnp.float32)
    w3 = kaiming(k3, H2, num_classes)
    b3 = jnp.zeros((num_classes,), jnp.float32)
    return w1, b1, w2, b2, w3, b3


if __name__ == "__main__":
    # Small, module-consistent shapes: batch=2, 3x16x16 images -> input_size=768.
    B, C, Hh, Ww = 2, 3, 16, 16
    input_size = C * Hh * Ww
    num_classes = 10

    key = jax.random.PRNGKey(0)
    k_x, k_p = jax.random.split(key)

    x = jax.random.normal(k_x, (B, C, Hh, Ww), dtype=jnp.float32)
    raw_params = init_params(k_p, input_size, num_classes)
    params = prepare_params(*raw_params)          # one-time bf16/pad conversion

    logits = mlp_classifier_forward(x, *params, num_classes=num_classes)
    jax.block_until_ready(logits)
    assert logits.shape == (B, num_classes)
    assert logits.dtype == jnp.float32

    # Pure-JAX reference mirroring the kernel's bf16 rounding points.
    w1, b1, w2, b2, w3, b3 = raw_params
    f32, bf16 = jnp.float32, jnp.bfloat16
    xf = x.reshape(B, -1).astype(bf16).astype(f32)
    w1f = w1.astype(bf16).astype(f32)
    w2f = w2.astype(bf16).astype(f32)
    w3f = w3.astype(bf16).astype(f32)
    r1 = jnp.maximum(xf @ w1f + b1, 0.0).astype(bf16).astype(f32)
    r2 = jnp.maximum(r1 @ w2f + b2, 0.0).astype(bf16).astype(f32)
    ref = (r2 @ w3f + b3).astype(bf16).astype(f32)
    assert jnp.allclose(logits, ref, atol=2e-2, rtol=2e-2), (
        float(jnp.max(jnp.abs(logits - ref))))

    print("KERNEL_OK")
</pallas_src>

<mosaic_0001>
module attributes {stable_mosaic.version = 11 : i64} {
  func.func @_mlp_kernel(%arg0: i32, %arg1: i32, %arg2: memref<16x768xf32, #tpu.memory_space<vmem>>, %arg3: memref<768x512xbf16, #tpu.memory_space<vmem>>, %arg4: memref<1x512xf32, #tpu.memory_space<vmem>>, %arg5: memref<512x128xbf16, #tpu.memory_space<vmem>>, %arg6: memref<1x128xf32, #tpu.memory_space<vmem>>, %arg7: memref<128x128xbf16, #tpu.memory_space<vmem>>, %arg8: memref<1x128xf32, #tpu.memory_space<vmem>>, %arg9: memref<16x128xbf16, #tpu.memory_space<vmem>>, %arg10: memref<16x512xf32, #tpu.memory_space<vmem>>, %arg11: memref<16x512xbf16, #tpu.memory_space<vmem>>) attributes {dimension_semantics = [#tpu.dimension_semantics<parallel>, #tpu.dimension_semantics<arbitrary>], iteration_bounds = array<i64: 1, 1>, scalar_prefetch = 0 : i64, scratch_operands = 2 : i64, tpu.core_type = #tpu.core_type<tc>, window_params = [{transform_indices = @transform_0, window_bounds = array<i64: 16, 768>}, {transform_indices = @transform_1, window_bounds = array<i64: 768, 512>}, {pipeline_mode = #tpu.pipeline_mode<synchronous>, transform_indices = @transform_2, window_bounds = array<i64: 1, 512>}, {pipeline_mode = #tpu.pipeline_mode<synchronous>, transform_indices = @transform_3, window_bounds = array<i64: 512, 128>}, {pipeline_mode = #tpu.pipeline_mode<synchronous>, transform_indices = @transform_4, window_bounds = array<i64: 1, 128>}, {pipeline_mode = #tpu.pipeline_mode<synchronous>, transform_indices = @transform_5, window_bounds = array<i64: 128, 128>}, {pipeline_mode = #tpu.pipeline_mode<synchronous>, transform_indices = @transform_6, window_bounds = array<i64: 1, 128>}, {transform_indices = @transform_7, window_bounds = array<i64: 16, 128>}]} {
    %c0_i32 = arith.constant 0 : i32
    %0 = arith.cmpi eq, %arg1, %c0_i32 : i32
    %1 = arith.extui %0 : i1 to i32
    %c0_i32_0 = arith.constant 0 : i32
    %2 = arith.cmpi ne, %1, %c0_i32_0 : i32
    scf.if %2 {
      %cst_10 = arith.constant 0.000000e+00 : f32
      %13 = vector.broadcast %cst_10 : f32 to vector<16x512xf32>
      %c0_11 = arith.constant 0 : index
      %c0_12 = arith.constant 0 : index
      %14 = vector.load %arg10[%c0_11, %c0_12] : memref<16x512xf32, #tpu.memory_space<vmem>>, vector<16x512xf32>
      tpu.vector_store %arg10[%c0_11, %c0_12], %13 {strides = array<i32>} : memref<16x512xf32, #tpu.memory_space<vmem>>, vector<16x512xf32>,
    } else {
    }
    %c0 = arith.constant 0 : index
    %c0_1 = arith.constant 0 : index
    %3 = vector.load %arg10[%c0, %c0_1] : memref<16x512xf32, #tpu.memory_space<vmem>>, vector<16x512xf32>
    %c0_2 = arith.constant 0 : index
    %c0_3 = arith.constant 0 : index
    %4 = vector.load %arg2[%c0_2, %c0_3] : memref<16x768xf32, #tpu.memory_space<vmem>>, vector<16x768xf32>
    %5 = arith.truncf %4 : vector<16x768xf32> to vector<16x768xbf16>
    %c0_4 = arith.constant 0 : index
    %c0_5 = arith.constant 0 : index
    %6 = vector.load %arg3[%c0_4, %c0_5] : memref<768x512xbf16, #tpu.memory_space<vmem>>, vector<768x512xbf16>
    %cst = arith.constant dense<0.000000e+00> : vector<16x512xf32>
    %7 = tpu.matmul %5, %6, %cst {dimension_numbers = #tpu.dot_dimension_numbers<[1], [0], [0], [1], [0, 0, 1, 1], [], []>} : vector<16x768xbf16>, vector<768x512xbf16>, vector<16x512xf32> -> vector<16x512xf32>
    %8 = arith.addf %3, %7 : vector<16x512xf32>
    %c0_6 = arith.constant 0 : index
    %c0_7 = arith.constant 0 : index
    %9 = vector.load %arg10[%c0_6, %c0_7] : memref<16x512xf32, #tpu.memory_space<vmem>>, vector<16x512xf32>
    tpu.vector_store %arg10[%c0_6, %c0_7], %8 {strides = array<i32>} : memref<16x512xf32, #tpu.memory_space<vmem>>, vector<16x512xf32>,
    %c0_i32_8 = arith.constant 0 : i32
    %10 = arith.cmpi eq, %arg1, %c0_i32_8 : i32
    %11 = arith.extui %10 : i1 to i32
    %c0_i32_9 = arith.constant 0 : i32
    %12 = arith.cmpi ne, %11, %c0_i32_9 : i32
    scf.if %12 {
      %c0_10 = arith.constant 0 : index
      %c0_11 = arith.constant 0 : index
      %13 = vector.load %arg10[%c0_10, %c0_11] : memref<16x512xf32, #tpu.memory_space<vmem>>, vector<16x512xf32>
      %c0_12 = arith.constant 0 : index
      %c0_13 = arith.constant 0 : index
      %14 = vector.load %arg4[%c0_12, %c0_13] : memref<1x512xf32, #tpu.memory_space<vmem>>, vector<1x512xf32>
      %15 = vector.broadcast %14 : vector<1x512xf32> to vector<16x512xf32>
      %16 = arith.addf %13, %15 : vector<16x512xf32>
      %cst_14 = arith.constant 0.000000e+00 : f32
      %17 = vector.broadcast %cst_14 : f32 to vector<16x512xf32>
      %18 = arith.maximumf %16, %17 : vector<16x512xf32>
      %19 = arith.truncf %18 : vector<16x512xf32> to vector<16x512xbf16>
      %c0_15 = arith.constant 0 : index
      %c0_16 = arith.constant 0 : index
      %20 = vector.load %arg11[%c0_15, %c0_16] : memref<16x512xbf16, #tpu.memory_space<vmem>>, vector<16x512xbf16>
      tpu.vector_store %arg11[%c0_15, %c0_16], %19 {strides = array<i32>} : memref<16x512xbf16, #tpu.memory_space<vmem>>, vector<16x512xbf16>,
      %c0_17 = arith.constant 0 : index
      %c0_18 = arith.constant 0 : index
      %21 = vector.load %arg11[%c0_17, %c0_18] : memref<16x512xbf16, #tpu.memory_space<vmem>>, vector<16x512xbf16>
      %c0_19 = arith.constant 0 : index
      %c0_20 = arith.constant 0 : index
      %22 = vector.load %arg5[%c0_19, %c0_20] : memref<512x128xbf16, #tpu.memory_space<vmem>>, vector<512x128xbf16>
      %cst_21 = arith.constant dense<0.000000e+00> : vector<16x128xf32>
      %23 = tpu.matmul %21, %22, %cst_21 {dimension_numbers = #tpu.dot_dimension_numbers<[1], [0], [0], [1], [0, 0, 1, 1], [], []>} : vector<16x512xbf16>, vector<512x128xbf16>, vector<16x128xf32> -> vector<16x128xf32>
      %c0_22 = arith.constant 0 : index
      %c0_23 = arith.constant 0 : index
      %24 = vector.load %arg6[%c0_22, %c0_23] : memref<1x128xf32, #tpu.memory_space<vmem>>, vector<1x128xf32>
      %25 = vector.broadcast %24 : vector<1x128xf32> to vector<16x128xf32>
      %26 = arith.addf %23, %25 : vector<16x128xf32>
      %cst_24 = arith.constant 0.000000e+00 : f32
      %27 = vector.broadcast %cst_24 : f32 to vector<16x128xf32>
      %28 = arith.maximumf %26, %27 : vector<16x128xf32>
      %29 = arith.truncf %28 : vector<16x128xf32> to vector<16x128xbf16>
      %c0_25 = arith.constant 0 : index
      %c0_26 = arith.constant 0 : index
      %30 = vector.load %arg7[%c0_25, %c0_26] : memref<128x128xbf16, #tpu.memory_space<vmem>>, vector<128x128xbf16>
      %cst_27 = arith.constant dense<0.000000e+00> : vector<16x128xf32>
      %31 = tpu.matmul %29, %30, %cst_27 {dimension_numbers = #tpu.dot_dimension_numbers<[1], [0], [0], [1], [0, 0, 1, 1], [], []>} : vector<16x128xbf16>, vector<128x128xbf16>, vector<16x128xf32> -> vector<16x128xf32>
      %c0_28 = arith.constant 0 : index
      %c0_29 = arith.constant 0 : index
      %32 = vector.load %arg8[%c0_28, %c0_29] : memref<1x128xf32, #tpu.memory_space<vmem>>, vector<1x128xf32>
      %33 = vector.broadcast %32 : vector<1x128xf32> to vector<16x128xf32>
      %34 = arith.addf %31, %33 : vector<16x128xf32>
      %35 = arith.truncf %34 : vector<16x128xf32> to vector<16x128xbf16>
      %c0_30 = arith.constant 0 : index
      %c0_31 = arith.constant 0 : index
      %36 = vector.load %arg9[%c0_30, %c0_31] : memref<16x128xbf16, #tpu.memory_space<vmem>>, vector<16x128xbf16>
      tpu.vector_store %arg9[%c0_30, %c0_31], %35 {strides = array<i32>} : memref<16x128xbf16, #tpu.memory_space<vmem>>, vector<16x128xbf16>,
    } else {
    }
    return
  }
  func.func @transform_0(%arg0: i32, %arg1: i32) -> (i32, i32) {
    %c0_i32 = arith.constant 0 : i32
    return %arg0, %arg1 : i32, i32
  }
  func.func @transform_1(%arg0: i32, %arg1: i32) -> (i32, i32) {
    %c0_i32 = arith.constant 0 : i32
    %c0_i32_0 = arith.constant 0 : i32
    return %arg1, %c0_i32 : i32, i32
  }
  func.func @transform_2(%arg0: i32, %arg1: i32) -> (i32, i32) {
    %c0_i32 = arith.constant 0 : i32
    %c0_i32_0 = arith.constant 0 : i32
    %c0_i32_1 = arith.constant 0 : i32
    return %c0_i32, %c0_i32_0 : i32, i32
  }
  func.func @transform_3(%arg0: i32, %arg1: i32) -> (i32, i32) {
    %c0_i32 = arith.constant 0 : i32
    %c0_i32_0 = arith.constant 0 : i32
    %c0_i32_1 = arith.constant 0 : i32
    return %c0_i32, %c0_i32_0 : i32, i32
  }
  func.func @transform_4(%arg0: i32, %arg1: i32) -> (i32, i32) {
    %c0_i32 = arith.constant 0 : i32
    %c0_i32_0 = arith.constant 0 : i32
    %c0_i32_1 = arith.constant 0 : i32
    return %c0_i32, %c0_i32_0 : i32, i32
  }
  func.func @transform_5(%arg0: i32, %arg1: i32) -> (i32, i32) {
    %c0_i32 = arith.constant 0 : i32
    %c0_i32_0 = arith.constant 0 : i32
    %c0_i32_1 = arith.constant 0 : i32
    return %c0_i32, %c0_i32_0 : i32, i32
  }
  func.func @transform_6(%arg0: i32, %arg1: i32) -> (i32, i32) {
    %c0_i32 = arith.constant 0 : i32
    %c0_i32_0 = arith.constant 0 : i32
    %c0_i32_1 = arith.constant 0 : i32
    return %c0_i32, %c0_i32_0 : i32, i32
  }
  func.func @transform_7(%arg0: i32, %arg1: i32) -> (i32, i32) {
    %c0_i32 = arith.constant 0 : i32
    %c0_i32_0 = arith.constant 0 : i32
    return %arg0, %c0_i32 : i32, i32
  }
}

</mosaic_0001>

<bundles_post_ra>
// kernel: mlp_classifier_forward.1
= control target key start
LH: loop header
LB: loop body
LE: loop exit
PB: predicated region body
PF: predicated region fallthrough
CT: control target
= control target key end

     0   :  { %12 = vsyncpa [#allocation5], 0  ;;  %s3227_s0 = inlined_call_operand.vmem [shape: f32[2,768], index: 0, kind: input, shape index: {}]   ;;  %s3228_s1 = inlined_call_operand.hbm [shape: bf16[768,512], index: 1, kind: input, shape index: {}]   ;;  %s3229_s2 = inlined_call_operand.vmem [shape: f32[1,512], index: 2, kind: input, shape index: {}]   ;;  %s3230_s3 = inlined_call_operand.hbm [shape: bf16[512,128], index: 3, kind: input, shape index: {}]   ;;  %s3231_s4 = inlined_call_operand.vmem [shape: f32[1,128], index: 4, kind: input, shape index: {}]   ;;  %s3232_s5 = inlined_call_operand.vmem [shape: bf16[128,128], index: 5, kind: input, shape index: {}]   ;;  %s3233_s6 = inlined_call_operand.vmem [shape: f32[1,128], index: 6, kind: input, shape index: {}]   ;;  %s3234_s7 = inlined_call_operand.vmem [shape: bf16[2,128], index: 7, kind: output, shape index: {}]  }
   0x1   :  { %13 = vsyncpa [#allocation7], 0  ;;  %s3018_s24 = smov [#allocation4]   ;;  %s2970_s28 = scalar_lea.hbm %s3228_s1, 24576 }
   0x2   :  { %s21_s25 = sshll.u32 %s3018_s24, 4  ;;  %p2971_p0 = scmp.ne.s32.totalorder %s3228_s1, %s2970_s28  ;;  %s22_s25 = int_to_ptr.vmem [resolvable:$true] %s21_s25 }
   0x3   :  { %p2974_p1 = scmp.lt.u32.totalorder %s2970_s28, %s3228_s1 }
   0x5   :  { %p2976_p2 = pnand %p2974_p1, %p2971_p0 }
   0x7   :  { %2979 = shalt.err (!%p2976_p2)
}
   0x8   :  { %s2980_s10 = scalar_lea.vmem %s22_s25, 24576  ;;  %p2985_p4 = scmp.lt.s32.totalorder %s22_s25, %s22_s25 }
   0x9   :  { %p2981_p3 = scmp.ne.s32.totalorder %s22_s25, %s2980_s10  ;;  %p2986_p5 = scmp.lt.s32.totalorder %s2980_s10, %s2980_s10 }
   0xb   :  { %p2987_p6 = por %p2986_p5, %p2985_p4 }
   0xd   :  { %p2988_p7 = pnand %p2987_p6, %p2981_p3 }
   0xf   :  { %2991 = shalt.err (!%p2988_p7)
}
  0x10   :  { %s3019_s11 = smov 256   ;;  %s3020_s12 = smov 16  }
  0x11   :  { %27 = dma.hbm_to_vmem [thread:$0]  %s3228_s1, 24576, %s22_s25, [#allocation5], %s3019_s11, %s3019_s11, %s3020_s12  }
  0x12   :  { %s3021_s15 = smov [#allocation6]   ;;  %s2992_s19 = scalar_lea.hbm %s3230_s3, 4096 }
  0x13   :  { %s35_s16 = sshll.u32 %s3021_s15, 4  ;;  %p2993_p8 = scmp.ne.s32.totalorder %s3230_s3, %s2992_s19  ;;  %s36_s16 = int_to_ptr.vmem [resolvable:$true] %s35_s16 }
  0x14   :  { %p2996_p9 = scmp.lt.u32.totalorder %s2992_s19, %s3230_s3 }
  0x16   :  { %p2998_p10 = pnand %p2996_p9, %p2993_p8 }
  0x18   :  { %3001 = shalt.err (!%p2998_p10)
}
  0x19   :  { %s3002_s24 = scalar_lea.vmem %s36_s16, 4096  ;;  %p3007_p12 = scmp.lt.s32.totalorder %s36_s16, %s36_s16 }
  0x1a   :  { %p3003_p11 = scmp.ne.s32.totalorder %s36_s16, %s3002_s24  ;;  %p3008_p13 = scmp.lt.s32.totalorder %s3002_s24, %s3002_s24 }
  0x1c   :  { %p3009_p0 = por %p3008_p13, %p3007_p12 }
  0x1e   :  { %p3010_p1 = pnand %p3009_p0, %p3003_p11 }
  0x20   :  { %3013 = shalt.err (!%p3010_p1)
}
  0x21   :  { %s3022_s1 = smov 64   ;;  %s3023_s25 = smov 4  }
  0x22   :  { %41 = dma.hbm_to_vmem [thread:$0]  %s3230_s3, 4096, %s36_s16, [#allocation7], %s3022_s1, %s3022_s1, %s3023_s25  }
  0x23   :  { %3014 = dma.done.wait [#allocation5], 24576  }
  0x24   :  { %3015 = vsyncadd [#allocation5], 4294942720 }
  0x25   :  { %3016 = dma.done.wait [#allocation7], 4096  }
  0x26   :  { %3017 = vsyncadd [#allocation7], 4294963200  ;;  %v2626_v0 = vld [vmem:[#allocation4 + $0x4] ss:$16 sps:$4 sm:$0xff]   ;;  %v2628_v1 = vld [vmem:[#allocation4 + $0xc] ss:$16 sps:$4 sm:$0xff]   ;;  %v114_v41 = vlaneseq }
  0x27   :  { %1385 = vmatprep.subr.bf16.mxu0 %v2626_v0  ;;  %v2630_v2 = vld [vmem:[#allocation4] ss:$16 sps:$4 sm:$0xff]   ;;  %v2631_v3 = vld [vmem:[#allocation4 + $0x8] ss:$16 sps:$4 sm:$0xff]   ;;  %1514 = vmatprep.subr.bf16.mxu1 %v2628_v1  ;;  %v2632_v4 = vld [vmem:[#allocation4 + $0x24] ss:$16 sps:$4 sm:$0xff]  }
  0x28   :  { %1386 = vmatpush1.bf16.msra.mxu0 %v2630_v2  ;;  %1515 = vmatpush1.bf16.msra.mxu1 %v2631_v3  ;;  %v2634_v5 = vld [vmem:[#allocation4 + $0x2c] ss:$16 sps:$4 sm:$0xff]   ;;  %v2636_v6 = vld [vmem:[#allocation4 + $0x20] ss:$16 sps:$4 sm:$0xff]   ;;  %v2637_v7 = vld [vmem:[#allocation4 + $0x28] ss:$16 sps:$4 sm:$0xff]  }
  0x29   :  { %1387 = vmatprep.subr.bf16.mxu0 %v2632_v4  ;;  %1516 = vmatprep.subr.bf16.mxu1 %v2634_v5  ;;  %v2638_v8 = vld [vmem:[#allocation4 + $0x44] ss:$16 sps:$4 sm:$0xff]   ;;  %v2640_v9 = vld [vmem:[#allocation4 + $0x4c] ss:$16 sps:$4 sm:$0xff]   ;;  %v2642_v10 = vld [vmem:[#allocation4 + $0x40] ss:$16 sps:$4 sm:$0xff]  }
  0x2a   :  { %v2643_v11 = vld [vmem:[#allocation4 + $0x48] ss:$16 sps:$4 sm:$0xff]   ;;  %v2644_v12 = vld [vmem:[#allocation4 + $0x64] ss:$16 sps:$4 sm:$0xff]   ;;  %v2646_v13 = vld [vmem:[#allocation4 + $0x6c] ss:$16 sps:$4 sm:$0xff]  }
  0x2b   :  { %v2648_v14 = vld [vmem:[#allocation4 + $0x60] ss:$16 sps:$4 sm:$0xff]   ;;  %v2649_v15 = vld [vmem:[#allocation4 + $0x68] ss:$16 sps:$4 sm:$0xff]   ;;  %v2650_v16 = vld [vmem:[#allocation4 + $0x84] ss:$16 sps:$4 sm:$0xff]  }
  0x2c   :  { %1388 = vmatpush1.bf16.msra.mxu0 %v2636_v6  ;;  %1517 = vmatpush1.bf16.msra.mxu1 %v2637_v7  ;;  %v2652_v17 = vld [vmem:[#allocation4 + $0x8c] ss:$16 sps:$4 sm:$0xff]   ;;  %v2654_v18 = vld [vmem:[#allocation4 + $0x80] ss:$16 sps:$4 sm:$0xff]   ;;  %v2655_v19 = vld [vmem:[#allocation4 + $0x88] ss:$16 sps:$4 sm:$0xff]  }
  0x2d   :  { %1389 = vmatprep.subr.bf16.mxu0 %v2638_v8  ;;  %1518 = vmatprep.subr.bf16.mxu1 %v2640_v9  ;;  %v2656_v20 = vld [vmem:[#allocation4 + $0xa4] ss:$16 sps:$4 sm:$0xff]   ;;  %v2658_v21 = vld [vmem:[#allocation4 + $0xac] ss:$16 sps:$4 sm:$0xff]   ;;  %v2660_v22 = vld [vmem:[#allocation4 + $0xa0] ss:$16 sps:$4 sm:$0xff]  }
  0x2e   :  { %v2661_v23 = vld [vmem:[#allocation4 + $0xa8] ss:$16 sps:$4 sm:$0xff]   ;;  %v2662_v24 = vld [vmem:[#allocation4 + $0xc4] ss:$16 sps:$4 sm:$0xff]   ;;  %v2664_v25 = vld [vmem:[#allocation4 + $0xcc] ss:$16 sps:$4 sm:$0xff]  }
  0x2f   :  { %v2666_v26 = vld [vmem:[#allocation4 + $0xc0] ss:$16 sps:$4 sm:$0xff]   ;;  %v2667_v27 = vld [vmem:[#allocation4 + $0xc8] ss:$16 sps:$4 sm:$0xff]   ;;  %v2668_v28 = vld [vmem:[#allocation4 + $0xe4] ss:$16 sps:$4 sm:$0xff]  }
  0x30   :  { %1390 = vmatpush1.bf16.msra.mxu0 %v2642_v10  ;;  %1519 = vmatpush1.bf16.msra.mxu1 %v2643_v11  ;;  %v2670_v29 = vld [vmem:[#allocation4 + $0xec] ss:$16 sps:$4 sm:$0xff]   ;;  %v2672_v30 = vld [vmem:[#allocation4 + $0xe0] ss:$16 sps:$4 sm:$0xff]   ;;  %v2673_v31 = vld [vmem:[#allocation4 + $0xe8] ss:$16 sps:$4 sm:$0xff]  }
  0x31   :  { %1391 = vmatprep.subr.bf16.mxu0 %v2644_v12  ;;  %1520 = vmatprep.subr.bf16.mxu1 %v2646_v13  ;;  %v2674_v32 = vld [vmem:[#allocation4 + $0x104] ss:$16 sps:$4 sm:$0xff]   ;;  %v2676_v33 = vld [vmem:[#allocation4 + $0x10c] ss:$16 sps:$4 sm:$0xff]   ;;  %v2678_v34 = vld [vmem:[#allocation4 + $0x100] ss:$16 sps:$4 sm:$0xff]  }
  0x32   :  { %v2679_v35 = vld [vmem:[#allocation4 + $0x108] ss:$16 sps:$4 sm:$0xff]   ;;  %v2680_v36 = vld [vmem:[#allocation4 + $0x124] ss:$16 sps:$4 sm:$0xff]   ;;  %v2682_v37 = vld [vmem:[#allocation4 + $0x12c] ss:$16 sps:$4 sm:$0xff]  }
  0x33   :  { %v2684_v38 = vld [vmem:[#allocation4 + $0x120] ss:$16 sps:$4 sm:$0xff]   ;;  %v3024_v39 = vmov 1983009808   ;;  %v2685_v42 = vld [vmem:[#allocation4 + $0x128] ss:$16 sps:$4 sm:$0xff]  }
  0x34   :  { %1392 = vmatpush1.bf16.msra.mxu0 %v2648_v14  ;;  %1521 = vmatpush1.bf16.msra.mxu1 %v2649_v15  ;;  %v112_v40 = vunpack.c.l.s4 %v3024_v39  ;;  %v2686_v43 = vld [vmem:[#allocation4 + $0x144] ss:$16 sps:$4 sm:$0xff]   ;;  %v2688_v44 = vld [vmem:[#allocation4 + $0x14c] ss:$16 sps:$4 sm:$0xff]   ;;  %v2690_v45 = vld [vmem:[#allocation4 + $0x140] ss:$16 sps:$4 sm:$0xff]  }
  0x35   :  { %1393 = vmatprep.subr.bf16.mxu0 %v2650_v16  ;;  %1522 = vmatprep.subr.bf16.mxu1 %v2652_v17  ;;  %v2691_v46 = vld [vmem:[#allocation4 + $0x148] ss:$16 sps:$4 sm:$0xff]   ;;  %v3092_v48 = vshrl.u32 %v114_v41, 7  ;;  %v2692_v49 = vld [vmem:[#allocation4 + $0x164] ss:$16 sps:$4 sm:$0xff]   ;;  %vm3026_vm0 = vmmov 0  }
  0x36   :  { %v113_v47 = vunpack.c.0.s8 %v112_v40  ;;  %v2694_v50 = vld [vmem:[#allocation4 + $0x16c] ss:$16 sps:$4 sm:$0xff]   ;;  %v2696_v51 = vld [vmem:[#allocation4 + $0x160] ss:$16 sps:$4 sm:$0xff]   ;;  %v2697_v52 = vld [vmem:[#allocation4 + $0x168] ss:$16 sps:$4 sm:$0xff]  }
  0x37   :  { %v2698_v53 = vld [vmem:[#allocation4 + $0x184] ss:$16 sps:$4 sm:$0xff]   ;;  %v2700_v55 = vld [vmem:[#allocation4 + $0x18c] ss:$16 sps:$4 sm:$0xff]   ;;  %v2702_v59 = vld [vmem:[#allocation4 + $0x180] ss:$16 sps:$4 sm:$0xff]  }
  0x38   :  { %1394 = vmatpush1.bf16.msra.mxu0 %v2654_v18  ;;  %1523 = vmatpush1.bf16.msra.mxu1 %v2655_v19  ;;  %v3095_v54 = vsub.s32 %v113_v47, %v3092_v48  ;;  %v2722_v56 = vld [vmem:[%s3227_s0] ss:$12 sps:$4 sm:$0xff]   ;;  %v2725_v57 = vld [vmem:[%s3227_s0 + $0x18] ss:$12 sps:$4 sm:$0xff]   ;;  %v2728_v58 = vld [vmem:[%s3227_s0 + $0x30] ss:$12 sps:$4 sm:$0xff]  }
  0x39   :  { %1395 = vmatprep.subr.bf16.mxu0 %v2656_v20  ;;  %1524 = vmatprep.subr.bf16.mxu1 %v2658_v21  ;;  %v2703_v60 = vld [vmem:[#allocation4 + $0x188] ss:$16 sps:$4 sm:$0xff]   ;;  %v2704_v63 = vld [vmem:[#allocation4 + $0x1a4] ss:$16 sps:$4 sm:$0xff]   ;;  %v2706_v2 = vld [vmem:[#allocation4 + $0x1ac] ss:$16 sps:$4 sm:$0xff]  }
  0x3a   :  { %v117_v61 = vrot.slane %v2722_v56, %v3095_v54  ;;  %v2731_v62 = vld [vmem:[%s3227_s0 + $0x48] ss:$12 sps:$4 sm:$0xff]   ;;  %v131_v0 = vrot.slane %v2725_v57, %v3095_v54  ;;  %v171_v1 = vrot.slane %v2728_v58, %v3095_v54  ;;  %v2708_v4 = vld [vmem:[#allocation4 + $0x1a0] ss:$16 sps:$4 sm:$0xff]   ;;  %v2712_v8 = vld [vmem:[#allocation4 + $0x1cc] ss:$16 sps:$4 sm:$0xff]  }
  0x3b   :  { %v185_v3 = vrot.slane %v2731_v62, %v3095_v54  ;;  %v2709_v5 = vld [vmem:[#allocation4 + $0x1a8] ss:$16 sps:$4 sm:$0xff]   ;;  %v2710_v7 = vld [vmem:[#allocation4 + $0x1c4] ss:$16 sps:$4 sm:$0xff]   ;;  %v2714_v15 = vld [vmem:[#allocation4 + $0x1c0] ss:$16 sps:$4 sm:$0xff]  }
  0x3c   :  { %1396 = vmatpush1.bf16.msra.mxu0 %v2660_v22  ;;  %1525 = vmatpush1.bf16.msra.mxu1 %v2661_v23  ;;  %v140_v6 = vcombine.high %v117_v61, %v131_v0  ;;  %v2724_v10 = vld [vmem:[%s3227_s0 + $0x4] ss:$12 sps:$4 sm:$0xff]   ;;  %v2727_v11 = vld [vmem:[%s3227_s0 + $0x1c] ss:$12 sps:$4 sm:$0xff]   ;;  %v2730_v13 = vld [vmem:[%s3227_s0 + $0x34] ss:$12 sps:$4 sm:$0xff]  }
  0x3d   :  { %1397 = vmatprep.subr.bf16.mxu0 %v2662_v24  ;;  %1526 = vmatprep.subr.bf16.mxu1 %v2664_v25  ;;  %v194_v9 = vcombine.high %v171_v1, %v185_v3  ;;  %v2733_v14 = vld [vmem:[%s3227_s0 + $0x4c] ss:$12 sps:$4 sm:$0xff]   ;;  %v2716_v17 = vld [vmem:[#allocation4 + $0x1e4] ss:$16 sps:$4 sm:$0xff]   ;;  %v3126_v19 = vrot.slane %v2724_v10, %v3095_v54  ;;  %v3129_v20 = vrot.slane %v2727_v11, %v3095_v54  ;;  %v2720_v23 = vld [vmem:[#allocation4 + $0x1e0] ss:$16 sps:$4 sm:$0xff]  }
  0x3e   :  { %v2715_v16 = vld [vmem:[#allocation4 + $0x1c8] ss:$16 sps:$4 sm:$0xff]   ;;  %v2718_v18 = vld [vmem:[#allocation4 + $0x1ec] ss:$16 sps:$4 sm:$0xff]   ;;  %v3132_v21 = vrot.slane %v2730_v13, %v3095_v54  ;;  %v3135_v22 = vrot.slane %v2733_v14, %v3095_v54  ;;  %v139_v25 = vcombine.low %v117_v61, %v131_v0  ;;  %v2748_v39 = vld [vmem:[#allocation4 + $0x244] ss:$16 sps:$4 sm:$0xff]  }
  0x3f   :  { %v228_v12 = vpack.c.bf16 %v194_v9, %v140_v6  ;;  %v2721_v24 = vld [vmem:[#allocation4 + $0x1e8] ss:$16 sps:$4 sm:$0xff]   ;;  %v2751_v40 = vld [vmem:[#allocation4 + $0x24c] ss:$16 sps:$4 sm:$0xff]   ;;  %v2746_v41 = vld [vmem:[#allocation4 + $0x240] ss:$16 sps:$4 sm:$0xff]  }
  0x40   :  { %1398 = vmatpush1.bf16.msra.mxu0 %v2666_v26  ;;  %1527 = vmatpush1.bf16.msra.mxu1 %v2667_v27  ;;  %v193_v26 = vcombine.low %v171_v1, %v185_v3  ;;  %v2736_v27 = vld [vmem:[#allocation4 + $0x204] ss:$16 sps:$4 sm:$0xff]   ;;  %v2767_v56 = vld [vmem:[#allocation4 + $0x2a8] ss:$16 sps:$4 sm:$0xff]   ;;  %v2775_v58 = vld [vmem:[#allocation4 + $0x2cc] ss:$16 sps:$4 sm:$0xff]  }
  0x41   :  { %1399 = vmatprep.subr.bf16.mxu0 %v2668_v28  ;;  %1528 = vmatprep.subr.bf16.mxu1 %v2670_v29  ;;  %v2739_v28 = vld [vmem:[#allocation4 + $0x20c] ss:$16 sps:$4 sm:$0xff]   ;;  %v142_v29 = vcombine.high %v3126_v19, %v3129_v20  ;;  %v2760_v47 = vld [vmem:[#allocation4 + $0x284] ss:$16 sps:$4 sm:$0xff]   ;;  %v2779_v0 = vld [vmem:[#allocation4 + $0x2e8] ss:$16 sps:$4 sm:$0xff]  }
  0x42   :  { %1417 = vmatprep.mubr.bf16.mxu0 %v228_v12  ;;  %1546 = vmatprep.mubr.bf16.mxu1 %v228_v12  ;;  %v2772_v57 = vld [vmem:[#allocation4 + $0x2c4] ss:$16 sps:$4 sm:$0xff]   ;;  %v2781_v62 = vld [vmem:[#allocation4 + $0x2ec] ss:$16 sps:$4 sm:$0xff]   ;;  %v2782_v3 = vld [vmem:[#allocation4 + $0x300] ss:$16 sps:$4 sm:$0xff]  }
  0x43   :  { %v2778_v61 = vld [vmem:[#allocation4 + $0x2e4] ss:$16 sps:$4 sm:$0xff]   ;;  %v2793_v6 = vld [vmem:[#allocation4 + $0x32c] ss:$16 sps:$4 sm:$0xff]   ;;  %v2794_v11 = vld [vmem:[#allocation4 + $0x340] ss:$16 sps:$4 sm:$0xff]  }
  0x44   :  { %1400 = vmatpush1.bf16.msra.mxu0 %v2672_v30  ;;  %1529 = vmatpush1.bf16.msra.mxu1 %v2673_v31  ;;  %v196_v30 = vcombine.high %v3132_v21, %v3135_v22  ;;  %v2734_v31 = vld [vmem:[#allocation4 + $0x200] ss:$16 sps:$4 sm:$0xff]   ;;  %v2784_v1 = vld [vmem:[#allocation4 + $0x304] ss:$16 sps:$4 sm:$0xff]   ;;  %v2799_v10 = vld [vmem:[#allocation4 + $0x34c] ss:$16 sps:$4 sm:$0xff]  }
  0x45   :  { %1401 = vmatprep.subr.bf16.mxu0 %v2674_v32  ;;  %1530 = vmatprep.subr.bf16.mxu1 %v2676_v33  ;;  %v2737_v32 = vld [vmem:[#allocation4 + $0x208] ss:$16 sps:$4 sm:$0xff]   ;;  %v227_v33 = vpack.c.bf16 %v193_v26, %v139_v25  ;;  %v2796_v9 = vld [vmem:[#allocation4 + $0x344] ss:$16 sps:$4 sm:$0xff]   ;;  %v2805_v14 = vld [vmem:[#allocation4 + $0x36c] ss:$16 sps:$4 sm:$0xff]  }
  0x46   :  { %v2797_v12 = vld [vmem:[#allocation4 + $0x348] ss:$16 sps:$4 sm:$0xff]   ;;  %v2802_v13 = vld [vmem:[#allocation4 + $0x364] ss:$16 sps:$4 sm:$0xff]   ;;  %v2817_v26 = vld [vmem:[#allocation4 + $0x3ac] ss:$16 sps:$4 sm:$0xff]  }
  0x47   :  { %v2814_v25 = vld [vmem:[#allocation4 + $0x3a4] ss:$16 sps:$4 sm:$0xff]  }
  0x48   :  { %1402 = vmatpush1.bf16.msra.mxu0 %v2678_v34  ;;  %1531 = vmatpush1.bf16.msra.mxu1 %v2679_v35  ;;  %v2742_v34 = vld [vmem:[#allocation4 + $0x224] ss:$16 sps:$4 sm:$0xff]   ;;  %v2745_v35 = vld [vmem:[#allocation4 + $0x22c] ss:$16 sps:$4 sm:$0xff]  }
  0x49   :  { %1403 = vmatprep.subr.bf16.mxu0 %v2680_v36  ;;  %1532 = vmatprep.subr.bf16.mxu1 %v2682_v37  ;;  %v230_v36 = vpack.c.bf16 %v196_v30, %v142_v29  ;;  %v2740_v37 = vld [vmem:[#allocation4 + $0x220] ss:$16 sps:$4 sm:$0xff]   ;;  %v2820_v29 = vld [vmem:[#allocation4 + $0x3c4] ss:$16 sps:$4 sm:$0xff]   ;;  %v2823_v30 = vld [vmem:[#allocation4 + $0x3cc] ss:$16 sps:$4 sm:$0xff]  }
  0x4c   :  { %1404 = vmatpush1.bf16.msra.mxu0 %v2684_v38  ;;  %1533 = vmatpush1.bf16.msra.mxu1 %v2685_v42  ;;  %v2743_v38 = vld [vmem:[#allocation4 + $0x228] ss:$16 sps:$4 sm:$0xff]  }
  0x4d   :  { %1405 = vmatprep.subr.bf16.mxu0 %v2686_v43  ;;  %1534 = vmatprep.subr.bf16.mxu1 %v2688_v44  ;;  %v2749_v42 = vld [vmem:[#allocation4 + $0x248] ss:$16 sps:$4 sm:$0xff]   ;;  %v2754_v43 = vld [vmem:[#allocation4 + $0x264] ss:$16 sps:$4 sm:$0xff]   ;;  %v2757_v44 = vld [vmem:[#allocation4 + $0x26c] ss:$16 sps:$4 sm:$0xff]  }
  0x50   :  { %1406 = vmatpush1.bf16.msra.mxu0 %v2690_v45  ;;  %1535 = vmatpush1.bf16.msra.mxu1 %v2691_v46  ;;  %v2752_v45 = vld [vmem:[#allocation4 + $0x260] ss:$16 sps:$4 sm:$0xff]   ;;  %v2755_v46 = vld [vmem:[#allocation4 + $0x268] ss:$16 sps:$4 sm:$0xff]  }
  0x51   :  { %1407 = vmatprep.subr.bf16.mxu0 %v2692_v49  ;;  %1536 = vmatprep.subr.bf16.mxu1 %v2694_v50  ;;  %v2763_v49 = vld [vmem:[#allocation4 + $0x28c] ss:$16 sps:$4 sm:$0xff]   ;;  %v2758_v50 = vld [vmem:[#allocation4 + $0x280] ss:$16 sps:$4 sm:$0xff]  }
  0x54   :  { %1408 = vmatpush1.bf16.msra.mxu0 %v2696_v51  ;;  %1537 = vmatpush1.bf16.msra.mxu1 %v2697_v52  ;;  %v2761_v51 = vld [vmem:[#allocation4 + $0x288] ss:$16 sps:$4 sm:$0xff]   ;;  %v2766_v52 = vld [vmem:[#allocation4 + $0x2a4] ss:$16 sps:$4 sm:$0xff]  }
  0x55   :  { %1409 = vmatprep.subr.bf16.mxu0 %v2698_v53  ;;  %1538 = vmatprep.subr.bf16.mxu1 %v2700_v55  ;;  %v2769_v53 = vld [vmem:[#allocation4 + $0x2ac] ss:$16 sps:$4 sm:$0xff]   ;;  %v2764_v55 = vld [vmem:[#allocation4 + $0x2a0] ss:$16 sps:$4 sm:$0xff]  }
  0x58   :  { %1410 = vmatpush1.bf16.msra.mxu0 %v2702_v59  ;;  %1539 = vmatpush1.bf16.msra.mxu1 %v2703_v60  ;;  %v2770_v59 = vld [vmem:[#allocation4 + $0x2c0] ss:$16 sps:$4 sm:$0xff]   ;;  %v2773_v60 = vld [vmem:[#allocation4 + $0x2c8] ss:$16 sps:$4 sm:$0xff]  }
  0x59   :  { %1411 = vmatprep.subr.bf16.mxu0 %v2704_v63  ;;  %1540 = vmatprep.subr.bf16.mxu1 %v2706_v2  ;;  %v2776_v63 = vld [vmem:[#allocation4 + $0x2e0] ss:$16 sps:$4 sm:$0xff]   ;;  %v2787_v2 = vld [vmem:[#allocation4 + $0x30c] ss:$16 sps:$4 sm:$0xff]  }
  0x5c   :  { %1412 = vmatpush1.bf16.msra.mxu0 %v2708_v4  ;;  %1541 = vmatpush1.bf16.msra.mxu1 %v2709_v5  ;;  %v2785_v4 = vld [vmem:[#allocation4 + $0x308] ss:$16 sps:$4 sm:$0xff]   ;;  %v2790_v5 = vld [vmem:[#allocation4 + $0x324] ss:$16 sps:$4 sm:$0xff]  }
  0x5d   :  { %1413 = vmatprep.subr.bf16.mxu0 %v2710_v7  ;;  %1542 = vmatprep.subr.bf16.mxu1 %v2712_v8  ;;  %v2788_v7 = vld [vmem:[#allocation4 + $0x320] ss:$16 sps:$4 sm:$0xff]   ;;  %v2791_v8 = vld [vmem:[#allocation4 + $0x328] ss:$16 sps:$4 sm:$0xff]  }
  0x60   :  { %1414 = vmatpush1.bf16.msra.mxu0 %v2714_v15  ;;  %1543 = vmatpush1.bf16.msra.mxu1 %v2715_v16  ;;  %v2800_v15 = vld [vmem:[#allocation4 + $0x360] ss:$16 sps:$4 sm:$0xff]   ;;  %v2803_v16 = vld [vmem:[#allocation4 + $0x368] ss:$16 sps:$4 sm:$0xff]  }
  0x61   :  { %1415 = vmatprep.subr.bf16.mxu0 %v2716_v17  ;;  %1544 = vmatprep.subr.bf16.mxu1 %v2718_v18  ;;  %v2808_v17 = vld [vmem:[#allocation4 + $0x384] ss:$16 sps:$4 sm:$0xff]   ;;  %v2811_v18 = vld [vmem:[#allocation4 + $0x38c] ss:$16 sps:$4 sm:$0xff]  }
  0x64   :  { %1416 = vmatpush1.bf16.msra.mxu0 %v2720_v23  ;;  %1545 = vmatpush1.bf16.msra.mxu1 %v2721_v24  ;;  %v2806_v23 = vld [vmem:[#allocation4 + $0x380] ss:$16 sps:$4 sm:$0xff]   ;;  %v2809_v24 = vld [vmem:[#allocation4 + $0x388] ss:$16 sps:$4 sm:$0xff]  }
  0x65   :  { %1428 = vmatprep.subr.bf16.mxu0 %v2736_v27  ;;  %1557 = vmatprep.subr.bf16.mxu1 %v2739_v28  ;;  %v2812_v27 = vld [vmem:[#allocation4 + $0x3a0] ss:$16 sps:$4 sm:$0xff]   ;;  %v2815_v28 = vld [vmem:[#allocation4 + $0x3a8] ss:$16 sps:$4 sm:$0xff]  }
  0x67   :  { %1418 = vmatmul.mubr.bf16.vlgmr.msra.gmra.mrb[0].mxu0 %v227_v33  ;;  %1547 = vmatmul.mubr.bf16.vlgmr.msra.gmra.mrb[0].mxu1 %v227_v33  ;;  %v2826_v33 = vld [vmem:[#allocation4 + $0x3e4] ss:$16 sps:$4 sm:$0xff]  }
  0x68   :  { %1429 = vmatpush1.bf16.msra.mxu0 %v2734_v31  ;;  %1558 = vmatpush1.bf16.msra.mxu1 %v2737_v32  ;;  %v2818_v31 = vld [vmem:[#allocation4 + $0x3c0] ss:$16 sps:$4 sm:$0xff]   ;;  %v2821_v32 = vld [vmem:[#allocation4 + $0x3c8] ss:$16 sps:$4 sm:$0xff]  }
  0x69   :  { %1430 = vmatprep.subr.bf16.mxu0 %v2742_v34  ;;  %1559 = vmatprep.subr.bf16.mxu1 %v2745_v35  ;;  %v2829_v34 = vld [vmem:[#allocation4 + $0x3ec] ss:$16 sps:$4 sm:$0xff]   ;;  %v2824_v35 = vld [vmem:[#allocation4 + $0x3e0] ss:$16 sps:$4 sm:$0xff]  }
  0x6a   :  { %1460 = vmatprep.mubr.bf16.mxu0 %v230_v36  ;;  %1589 = vmatprep.mubr.bf16.mxu1 %v230_v36  ;;  %v2827_v36 = vld [vmem:[#allocation4 + $0x3e8] ss:$16 sps:$4 sm:$0xff]  }
  0x6c   :  { %1431 = vmatpush1.bf16.msra.mxu0 %v2740_v37  ;;  %1560 = vmatpush1.bf16.msra.mxu1 %v2743_v38  ;;  %v141_v37 = vcombine.low %v3126_v19, %v3129_v20  ;;  %v195_v38 = vcombine.low %v3132_v21, %v3135_v22  ;;  %v2836_v19 = vld [vmem:[#allocation4 + $0x420] ss:$16 sps:$4 sm:$0xff]   ;;  %v2839_v20 = vld [vmem:[#allocation4 + $0x428] ss:$16 sps:$4 sm:$0xff]   ;;  %v2844_v21 = vld [vmem:[#allocation4 + $0x444] ss:$16 sps:$4 sm:$0xff]  }
  0x6d   :  { %1432 = vmatprep.subr.bf16.mxu0 %v2748_v39  ;;  %1561 = vmatprep.subr.bf16.mxu1 %v2751_v40  ;;  %v2832_v39 = vld [vmem:[#allocation4 + $0x404] ss:$16 sps:$4 sm:$0xff]   ;;  %v2835_v40 = vld [vmem:[#allocation4 + $0x40c] ss:$16 sps:$4 sm:$0xff]  }
  0x6e   :  { %v2847_v22 = vld [vmem:[#allocation4 + $0x44c] ss:$16 sps:$4 sm:$0xff]  }
  0x70   :  { %1433 = vmatpush1.bf16.msra.mxu0 %v2746_v41  ;;  %1562 = vmatpush1.bf16.msra.mxu1 %v2749_v42  ;;  %v2830_v41 = vld [vmem:[#allocation4 + $0x400] ss:$16 sps:$4 sm:$0xff]   ;;  %v2833_v42 = vld [vmem:[#allocation4 + $0x408] ss:$16 sps:$4 sm:$0xff]  }
  0x71   :  { %1434 = vmatprep.subr.bf16.mxu0 %v2754_v43  ;;  %1563 = vmatprep.subr.bf16.mxu1 %v2757_v44  ;;  %v229_v43 = vpack.c.bf16 %v195_v38, %v141_v37  ;;  %v2838_v44 = vld [vmem:[#allocation4 + $0x424] ss:$16 sps:$4 sm:$0xff]   ;;  %v2907_v37 = vld [vmem:[#allocation4 + $0x58c] ss:$16 sps:$4 sm:$0xff]   ;;  %v2902_v38 = vld [vmem:[#allocation4 + $0x580] ss:$16 sps:$4 sm:$0xff]  }
  0x74   :  { %1435 = vmatpush1.bf16.msra.mxu0 %v2752_v45  ;;  %1564 = vmatpush1.bf16.msra.mxu1 %v2755_v46  ;;  %v2841_v45 = vld [vmem:[#allocation4 + $0x42c] ss:$16 sps:$4 sm:$0xff]   ;;  %v2842_v46 = vld [vmem:[#allocation4 + $0x440] ss:$16 sps:$4 sm:$0xff]  }
  0x75   :  { %1436 = vmatprep.subr.bf16.mxu0 %v2760_v47  ;;  %1565 = vmatprep.subr.bf16.mxu1 %v2763_v49  ;;  %v2845_v47 = vld [vmem:[#allocation4 + $0x448] ss:$16 sps:$4 sm:$0xff]   ;;  %v2850_v49 = vld [vmem:[#allocation4 + $0x464] ss:$16 sps:$4 sm:$0xff]  }
  0x78   :  { %1437 = vmatpush1.bf16.msra.mxu0 %v2758_v50  ;;  %1566 = vmatpush1.bf16.msra.mxu1 %v2761_v51  ;;  %v2853_v50 = vld [vmem:[#allocation4 + $0x46c] ss:$16 sps:$4 sm:$0xff]   ;;  %v2926_v51 = vld [vmem:[%s3227_s0 + $0x8] ss:$12 sps:$4 sm:$0xff]  }
  0x79   :  { %1438 = vmatprep.subr.bf16.mxu0 %v2766_v52  ;;  %1567 = vmatprep.subr.bf16.mxu1 %v2769_v53  ;;  %v2927_v52 = vld [vmem:[%s3227_s0 + $0x20] ss:$12 sps:$4 sm:$0xff]   ;;  %v2928_v53 = vld [vmem:[%s3227_s0 + $0x38] ss:$12 sps:$4 sm:$0xff]  }
  0x7c   :  { %1439 = vmatpush1.bf16.msra.mxu0 %v2764_v55  ;;  %1568 = vmatpush1.bf16.msra.mxu1 %v2767_v56  ;;  %v2929_v55 = vld [vmem:[%s3227_s0 + $0x50] ss:$12 sps:$4 sm:$0xff]  }
  0x7d   :  { %1440 = vmatprep.subr.bf16.mxu0 %v2772_v57  ;;  %1569 = vmatprep.subr.bf16.mxu1 %v2775_v58  ;;  %v2848_v56 = vld [vmem:[#allocation4 + $0x460] ss:$16 sps:$4 sm:$0xff]   ;;  %v3158_v57 = vrot.slane %v2926_v51, %v3095_v54  ;;  %v3161_v58 = vrot.slane %v2927_v52, %v3095_v54 }
  0x7e   :  { %v2930_v51 = vld [vmem:[#allocation6 + $0x40] sm:$0xff]  }
  0x7f   :  { %v2931_v52 = vld [vmem:[#allocation6 + $0xc0] sm:$0xff]  }
  0x80   :  { %1441 = vmatpush1.bf16.msra.mxu0 %v2770_v59  ;;  %1570 = vmatpush1.bf16.msra.mxu1 %v2773_v60  ;;  %v3164_v59 = vrot.slane %v2928_v53, %v3095_v54  ;;  %v2851_v60 = vld [vmem:[#allocation4 + $0x468] ss:$16 sps:$4 sm:$0xff]  }
  0x81   :  { %1442 = vmatprep.subr.bf16.mxu0 %v2778_v61  ;;  %1571 = vmatprep.subr.bf16.mxu1 %v2781_v62  ;;  %v3167_v61 = vrot.slane %v2929_v55, %v3095_v54  ;;  %v2856_v62 = vld [vmem:[#allocation4 + $0x484] ss:$16 sps:$4 sm:$0xff]   ;;  %v2865_v54 = vld [vmem:[#allocation4 + $0x4ac] ss:$16 sps:$4 sm:$0xff]  }
  0x82   :  { %v2932_v55 = vld [vmem:[#allocation6] sm:$0xff]  }
  0x84   :  { %1443 = vmatpush1.bf16.msra.mxu0 %v2776_v63  ;;  %1572 = vmatpush1.bf16.msra.mxu1 %v2779_v0  ;;  %v160_v63 = vcombine.high %v3158_v57, %v3161_v58  ;;  %v2859_v0 = vld [vmem:[#allocation4 + $0x48c] ss:$16 sps:$4 sm:$0xff]  }
  0x85   :  { %1444 = vmatprep.subr.bf16.mxu0 %v2784_v1  ;;  %1573 = vmatprep.subr.bf16.mxu1 %v2787_v2  ;;  %v214_v1 = vcombine.high %v3164_v59, %v3167_v61  ;;  %v2854_v2 = vld [vmem:[#allocation4 + $0x480] ss:$16 sps:$4 sm:$0xff]  }
  0x88   :  { %1445 = vmatpush1.bf16.msra.mxu0 %v2782_v3  ;;  %1574 = vmatpush1.bf16.msra.mxu1 %v2785_v4  ;;  %v2857_v3 = vld [vmem:[#allocation4 + $0x488] ss:$16 sps:$4 sm:$0xff]   ;;  %v232_v4 = vpack.c.bf16 %v214_v1, %v160_v63  ;;  %v2940_v63 = vld [vmem:[#allocation6 + $0x10] sm:$0xff]  }
  0x89   :  { %1446 = vmatprep.subr.bf16.mxu0 %v2790_v5  ;;  %1575 = vmatprep.subr.bf16.mxu1 %v2793_v6  ;;  %v2862_v5 = vld [vmem:[#allocation4 + $0x4a4] ss:$16 sps:$4 sm:$0xff]   ;;  %v2860_v6 = vld [vmem:[#allocation4 + $0x4a0] ss:$16 sps:$4 sm:$0xff]   ;;  %v2942_v1 = vld [vmem:[#allocation6 + $0x58] sm:$0xff]  }
  0x8c   :  { %1447 = vmatpush1.bf16.msra.mxu0 %v2788_v7  ;;  %1576 = vmatpush1.bf16.msra.mxu1 %v2791_v8  ;;  %v2863_v7 = vld [vmem:[#allocation4 + $0x4a8] ss:$16 sps:$4 sm:$0xff]   ;;  %v2868_v8 = vld [vmem:[#allocation4 + $0x4c4] ss:$16 sps:$4 sm:$0xff]  }
  0x8d   :  { %1448 = vmatprep.subr.bf16.mxu0 %v2796_v9  ;;  %1577 = vmatprep.subr.bf16.mxu1 %v2799_v10  ;;  %v2871_v9 = vld [vmem:[#allocation4 + $0x4cc] ss:$16 sps:$4 sm:$0xff]   ;;  %v2866_v10 = vld [vmem:[#allocation4 + $0x4c0] ss:$16 sps:$4 sm:$0xff]  }
  0x90   :  { %1449 = vmatpush1.bf16.msra.mxu0 %v2794_v11  ;;  %1578 = vmatpush1.bf16.msra.mxu1 %v2797_v12  ;;  %v2869_v11 = vld [vmem:[#allocation4 + $0x4c8] ss:$16 sps:$4 sm:$0xff]   ;;  %v2874_v12 = vld [vmem:[#allocation4 + $0x4e4] ss:$16 sps:$4 sm:$0xff]  }
  0x91   :  { %1450 = vmatprep.subr.bf16.mxu0 %v2802_v13  ;;  %1579 = vmatprep.subr.bf16.mxu1 %v2805_v14  ;;  %v2877_v13 = vld [vmem:[#allocation4 + $0x4ec] ss:$16 sps:$4 sm:$0xff]   ;;  %v2872_v14 = vld [vmem:[#allocation4 + $0x4e0] ss:$16 sps:$4 sm:$0xff]  }
  0x94   :  { %1451 = vmatpush1.bf16.msra.mxu0 %v2800_v15  ;;  %1580 = vmatpush1.bf16.msra.mxu1 %v2803_v16  ;;  %v2875_v15 = vld [vmem:[#allocation4 + $0x4e8] ss:$16 sps:$4 sm:$0xff]   ;;  %v2880_v16 = vld [vmem:[#allocation4 + $0x504] ss:$16 sps:$4 sm:$0xff]  }
  0x95   :  { %1452 = vmatprep.subr.bf16.mxu0 %v2808_v17  ;;  %1581 = vmatprep.subr.bf16.mxu1 %v2811_v18  ;;  %v2883_v17 = vld [vmem:[#allocation4 + $0x50c] ss:$16 sps:$4 sm:$0xff]   ;;  %v2878_v18 = vld [vmem:[#allocation4 + $0x500] ss:$16 sps:$4 sm:$0xff]  }
  0x98   :  { %1453 = vmatpush1.bf16.msra.mxu0 %v2806_v23  ;;  %1582 = vmatpush1.bf16.msra.mxu1 %v2809_v24  ;;  %v2881_v23 = vld [vmem:[#allocation4 + $0x508] ss:$16 sps:$4 sm:$0xff]   ;;  %v2886_v24 = vld [vmem:[#allocation4 + $0x524] ss:$16 sps:$4 sm:$0xff]  }
  0x99   :  { %1454 = vmatprep.subr.bf16.mxu0 %v2814_v25  ;;  %1583 = vmatprep.subr.bf16.mxu1 %v2817_v26  ;;  %v2889_v25 = vld [vmem:[#allocation4 + $0x52c] ss:$16 sps:$4 sm:$0xff]   ;;  %v2884_v26 = vld [vmem:[#allocation4 + $0x520] ss:$16 sps:$4 sm:$0xff]  }
  0x9c   :  { %1455 = vmatpush1.bf16.msra.mxu0 %v2812_v27  ;;  %1584 = vmatpush1.bf16.msra.mxu1 %v2815_v28  ;;  %v2887_v27 = vld [vmem:[#allocation4 + $0x528] ss:$16 sps:$4 sm:$0xff]   ;;  %v2892_v28 = vld [vmem:[#allocation4 + $0x544] ss:$16 sps:$4 sm:$0xff]  }
  0x9d   :  { %1456 = vmatprep.subr.bf16.mxu0 %v2820_v29  ;;  %1585 = vmatprep.subr.bf16.mxu1 %v2823_v30  ;;  %v2895_v29 = vld [vmem:[#allocation4 + $0x54c] ss:$16 sps:$4 sm:$0xff]   ;;  %v2890_v30 = vld [vmem:[#allocation4 + $0x540] ss:$16 sps:$4 sm:$0xff]  }
  0xa0   :  { %1457 = vmatpush1.bf16.msra.mxu0 %v2818_v31  ;;  %1586 = vmatpush1.bf16.msra.mxu1 %v2821_v32  ;;  %v2893_v31 = vld [vmem:[#allocation4 + $0x548] ss:$16 sps:$4 sm:$0xff]   ;;  %v2898_v32 = vld [vmem:[#allocation4 + $0x564] ss:$16 sps:$4 sm:$0xff]  }
  0xa1   :  { %1458 = vmatprep.subr.bf16.mxu0 %v2826_v33  ;;  %1587 = vmatprep.subr.bf16.mxu1 %v2829_v34  ;;  %v2901_v33 = vld [vmem:[#allocation4 + $0x56c] ss:$16 sps:$4 sm:$0xff]   ;;  %v2896_v34 = vld [vmem:[#allocation4 + $0x560] ss:$16 sps:$4 sm:$0xff]  }
  0xa4   :  { %1459 = vmatpush1.bf16.msra.mxu0 %v2824_v35  ;;  %1588 = vmatpush1.bf16.msra.mxu1 %v2827_v36  ;;  %v2899_v35 = vld [vmem:[#allocation4 + $0x568] ss:$16 sps:$4 sm:$0xff]   ;;  %v2904_v36 = vld [vmem:[#allocation4 + $0x584] ss:$16 sps:$4 sm:$0xff]  }
  0xa5   :  { %1471 = vmatprep.subr.bf16.mxu0 %v2832_v39  ;;  %1600 = vmatprep.subr.bf16.mxu1 %v2835_v40  ;;  %v2905_v39 = vld [vmem:[#allocation4 + $0x588] ss:$16 sps:$4 sm:$0xff]   ;;  %v2910_v40 = vld [vmem:[#allocation4 + $0x5a4] ss:$16 sps:$4 sm:$0xff]  }
  0xa7   :  { %1461 = vmatmul.mubr.bf16.vlgmr.msra.gmra.mrb[0].mxu0 %v229_v43  ;;  %1590 = vmatmul.mubr.bf16.vlgmr.msra.gmra.mrb[0].mxu1 %v229_v43  ;;  %v2911_v43 = vld [vmem:[#allocation4 + $0x5a8] ss:$16 sps:$4 sm:$0xff]  }
  0xa8   :  { %1472 = vmatpush1.bf16.msra.mxu0 %v2830_v41  ;;  %1601 = vmatpush1.bf16.msra.mxu1 %v2833_v42  ;;  %v2913_v41 = vld [vmem:[#allocation4 + $0x5ac] ss:$16 sps:$4 sm:$0xff]   ;;  %v2908_v42 = vld [vmem:[#allocation4 + $0x5a0] ss:$16 sps:$4 sm:$0xff]  }
  0xa9   :  { %1473 = vmatprep.subr.bf16.mxu0 %v2838_v44  ;;  %1602 = vmatprep.subr.bf16.mxu1 %v2841_v45  ;;  %v2916_v44 = vld [vmem:[#allocation4 + $0x5c4] ss:$16 sps:$4 sm:$0xff]   ;;  %v2919_v45 = vld [vmem:[#allocation4 + $0x5cc] ss:$16 sps:$4 sm:$0xff]  }
  0xaa   :  { %1503 = vmatprep.mubr.bf16.mxu0 %v232_v4  ;;  %1632 = vmatprep.mubr.bf16.mxu1 %v232_v4  ;;  %v2945_v4 = vld [vmem:[#allocation6 + $0x98] sm:$0xff]  }
  0xac   :  { %1474 = vmatpush1.bf16.msra.mxu0 %v2836_v19  ;;  %1603 = vmatpush1.bf16.msra.mxu1 %v2839_v20  ;;  %v2914_v19 = vld [vmem:[#allocation4 + $0x5c0] ss:$16 sps:$4 sm:$0xff]   ;;  %v2917_v20 = vld [vmem:[#allocation4 + $0x5c8] ss:$16 sps:$4 sm:$0xff]  }
  0xad   :  { %1475 = vmatprep.subr.bf16.mxu0 %v2844_v21  ;;  %1604 = vmatprep.subr.bf16.mxu1 %v2847_v22  ;;  %v2922_v21 = vld [vmem:[#allocation4 + $0x5e4] ss:$16 sps:$4 sm:$0xff]   ;;  %v2925_v22 = vld [vmem:[#allocation4 + $0x5ec] ss:$16 sps:$4 sm:$0xff]  }
  0xb0   :  { %1476 = vmatpush1.bf16.msra.mxu0 %v2842_v46  ;;  %1605 = vmatpush1.bf16.msra.mxu1 %v2845_v47  ;;  %v159_v46 = vcombine.low %v3158_v57, %v3161_v58  ;;  %v213_v47 = vcombine.low %v3164_v59, %v3167_v61  ;;  %v2935_v57 = vld [vmem:[#allocation6 + $0xc8] sm:$0xff]   ;;  %v2938_v61 = vld [vmem:[#allocation6 + $0x50] sm:$0xff]  }
  0xb1   :  { %1477 = vmatprep.subr.bf16.mxu0 %v2850_v49  ;;  %1606 = vmatprep.subr.bf16.mxu1 %v2853_v50  ;;  %v2920_v49 = vld [vmem:[#allocation4 + $0x5e0] ss:$16 sps:$4 sm:$0xff]   ;;  %v2923_v50 = vld [vmem:[#allocation4 + $0x5e8] ss:$16 sps:$4 sm:$0xff]  }
  0xb2   :  { %v231_v53 = vpack.c.bf16 %v213_v47, %v159_v46  ;;  %v2936_v58 = vld [vmem:[#allocation6 + $0x8] sm:$0xff]  }
  0xb3   :  { %v2937_v59 = vld [vmem:[#allocation6 + $0x88] sm:$0xff]  }
  0xb4   :  { %1478 = vmatpush1.bf16.msra.mxu0 %v2848_v56  ;;  %1607 = vmatpush1.bf16.msra.mxu1 %v2851_v60  ;;  %v2933_v56 = vld [vmem:[#allocation6 + $0x80] sm:$0xff]   ;;  %v2934_v60 = vld [vmem:[#allocation6 + $0x48] sm:$0xff]  }
  0xb5   :  { %1479 = vmatprep.subr.bf16.mxu0 %v2856_v62  ;;  %1608 = vmatprep.subr.bf16.mxu1 %v2859_v0  ;;  %v2939_v62 = vld [vmem:[#allocation6 + $0xd0] sm:$0xff]  }
  0xb6   :  { %v2941_v0 = vld [vmem:[#allocation6 + $0x90] sm:$0xff]  }
  0xb8   :  { %1480 = vmatpush1.bf16.msra.mxu0 %v2854_v2  ;;  %1609 = vmatpush1.bf16.msra.mxu1 %v2857_v3  ;;  %v2943_v2 = vld [vmem:[#allocation6 + $0xd8] sm:$0xff]  }
  0xb9   :  { %1481 = vmatprep.subr.bf16.mxu0 %v2862_v5  ;;  %1610 = vmatprep.subr.bf16.mxu1 %v2865_v54  ;;  %v2944_v3 = vld [vmem:[#allocation6 + $0x18] sm:$0xff]   ;;  %v2946_v5 = vld [vmem:[#allocation6 + $0x60] sm:$0xff]  }
  0xba   :  { %v2947_v54 = vld [vmem:[#allocation6 + $0xe0] sm:$0xff]  }
  0xbc   :  { %1482 = vmatpush1.bf16.msra.mxu0 %v2860_v6  ;;  %1611 = vmatpush1.bf16.msra.mxu1 %v2863_v7  ;;  %v2948_v6 = vld [vmem:[#allocation6 + $0x20] sm:$0xff]  }
  0xbd   :  { %1483 = vmatprep.subr.bf16.mxu0 %v2868_v8  ;;  %1612 = vmatprep.subr.bf16.mxu1 %v2871_v9  ;;  %v2949_v7 = vld [vmem:[#allocation6 + $0xa0] sm:$0xff]   ;;  %v2950_v8 = vld [vmem:[#allocation6 + $0x68] sm:$0xff]  }
  0xbe   :  { %v2951_v9 = vld [vmem:[#allocation6 + $0xe8] sm:$0xff]  }
  0xc0   :  { %1484 = vmatpush1.bf16.msra.mxu0 %v2866_v10  ;;  %1613 = vmatpush1.bf16.msra.mxu1 %v2869_v11  ;;  %v2952_v10 = vld [vmem:[#allocation6 + $0x28] sm:$0xff]  }
  0xc1   :  { %1485 = vmatprep.subr.bf16.mxu0 %v2874_v12  ;;  %1614 = vmatprep.subr.bf16.mxu1 %v2877_v13  ;;  %v2953_v11 = vld [vmem:[#allocation6 + $0xa8] sm:$0xff]   ;;  %v2954_v12 = vld [vmem:[#allocation6 + $0x70] sm:$0xff]  }
  0xc2   :  { %v2955_v13 = vld [vmem:[#allocation6 + $0xf0] sm:$0xff]  }
  0xc4   :  { %1486 = vmatpush1.bf16.msra.mxu0 %v2872_v14  ;;  %1615 = vmatpush1.bf16.msra.mxu1 %v2875_v15  ;;  %v2956_v14 = vld [vmem:[#allocation6 + $0x30] sm:$0xff]  }
  0xc5   :  { %1487 = vmatprep.subr.bf16.mxu0 %v2880_v16  ;;  %1616 = vmatprep.subr.bf16.mxu1 %v2883_v17  ;;  %v2957_v15 = vld [vmem:[#allocation6 + $0xb0] sm:$0xff]   ;;  %v2958_v16 = vld [vmem:[#allocation6 + $0x78] sm:$0xff]  }
  0xc6   :  { %v2959_v17 = vld [vmem:[#allocation6 + $0xf8] sm:$0xff]  }
  0xc8   :  { %1488 = vmatpush1.bf16.msra.mxu0 %v2878_v18  ;;  %1617 = vmatpush1.bf16.msra.mxu1 %v2881_v23  ;;  %v2960_v18 = vld [vmem:[#allocation6 + $0x38] sm:$0xff]  }
  0xc9   :  { %1489 = vmatprep.subr.bf16.mxu0 %v2886_v24  ;;  %1618 = vmatprep.subr.bf16.mxu1 %v2889_v25  ;;  %v2961_v23 = vld [vmem:[#allocation6 + $0xb8] sm:$0xff]   ;;  %v3025_v24 = vmov 0.0   ;;  %v1674_v25 = vsub.s32 0, %v3092_v48 }
  0xcc   :  { %1490 = vmatpush1.bf16.msra.mxu0 %v2884_v26  ;;  %1619 = vmatpush1.bf16.msra.mxu1 %v2887_v27  ;;  %v1682_v26 = vsub.s32 2, %v3092_v48  ;;  %v1670_v27 = vld [vmem:[%s3229_s2] sm:$0xf] }
  0xcd   :  { %1491 = vmatprep.subr.bf16.mxu0 %v2892_v28  ;;  %1620 = vmatprep.subr.bf16.mxu1 %v2895_v29  ;;  %v1678_v28 = vsub.s32 1, %v3092_v48  ;;  %v1686_v29 = vsub.s32 3, %v3092_v48 }
  0xd0   :  { %1492 = vmatpush1.bf16.msra.mxu0 %v2890_v30  ;;  %1621 = vmatpush1.bf16.msra.mxu1 %v2893_v31  ;;  %v1675_v30 = vrot.slane %v1670_v27, %v1674_v25  ;;  %v1683_v31 = vrot.slane %v1670_v27, %v1682_v26 }
  0xd1   :  { %1493 = vmatprep.subr.bf16.mxu0 %v2898_v32  ;;  %1622 = vmatprep.subr.bf16.mxu1 %v2901_v33  ;;  %v1679_v32 = vrot.slane %v1670_v27, %v1678_v28  ;;  %v1687_v33 = vrot.slane %v1670_v27, %v1686_v29  ;;  %v3027_v27 = vmov 1966171168  }
  0xd2   :  { %v2184_v28 = vunpack.c.l.s4 %v3027_v27 }
  0xd4   :  { %1494 = vmatpush1.bf16.msra.mxu0 %v2896_v34  ;;  %1623 = vmatpush1.bf16.msra.mxu1 %v2899_v35  ;;  %v2185_v29 = vunpack.c.0.s8 %v2184_v28 }
  0xd5   :  { %1495 = vmatprep.subr.bf16.mxu0 %v2904_v36  ;;  %1624 = vmatprep.subr.bf16.mxu1 %v2907_v37 }
  0xd8   :  { %1496 = vmatpush1.bf16.msra.mxu0 %v2902_v38  ;;  %1625 = vmatpush1.bf16.msra.mxu1 %v2905_v39 }
  0xd9   :  { %1497 = vmatprep.subr.bf16.mxu0 %v2910_v40  ;;  %1626 = vmatprep.subr.bf16.mxu1 %v2913_v41 }
  0xdc   :  { %1498 = vmatpush1.bf16.msra.mxu0 %v2908_v42  ;;  %1627 = vmatpush1.bf16.msra.mxu1 %v2911_v43 }
  0xdd   :  { %1499 = vmatprep.subr.bf16.mxu0 %v2916_v44  ;;  %1628 = vmatprep.subr.bf16.mxu1 %v2919_v45 }
  0xe0   :  { %1500 = vmatpush1.bf16.msra.mxu0 %v2914_v19  ;;  %1629 = vmatpush1.bf16.msra.mxu1 %v2917_v20 }
  0xe1   :  { %1501 = vmatprep.subr.bf16.mxu0 %v2922_v21  ;;  %1630 = vmatprep.subr.bf16.mxu1 %v2925_v22 }
  0xe4   :  { %1502 = vmatpush1.bf16.msra.mxu0 %v2920_v49  ;;  %1631 = vmatpush1.bf16.msra.mxu1 %v2923_v50 }
  0xe5   :  { %2527 = vmatprep.subr.bf16.mxu0 %v2930_v51  ;;  %2549 = vmatprep.subr.bf16.mxu1 %v2931_v52 }
  0xe7   :  { %1504 = vmatmul.mubr.bf16.vlgmr.msra.gmra.mrb[0].mxu0 %v231_v53  ;;  %1633 = vmatmul.mubr.bf16.vlgmr.msra.gmra.mrb[0].mxu1 %v231_v53 }
  0xe8   :  { %2528 = vmatpush3.bf16.msra.mxu0 %v2932_v55  ;;  %2550 = vmatpush3.bf16.msra.mxu1 %v2933_v56 }
  0xe9   :  { %2529 = vmatprep.subr.bf16.mxu0 %v2934_v60  ;;  %2551 = vmatprep.subr.bf16.mxu1 %v2935_v57 }
  0xec   :  { %2530 = vmatpush3.bf16.msra.mxu0 %v2936_v58  ;;  %2552 = vmatpush3.bf16.msra.mxu1 %v2937_v59  ;;  %v2962_v59 = vld [vmem:[%s3232_s5] sm:$0xff]  }
  0xed   :  { %2531 = vmatprep.subr.bf16.mxu0 %v2938_v61  ;;  %2553 = vmatprep.subr.bf16.mxu1 %v2939_v62  ;;  %v2963_v61 = vld [vmem:[%s3232_s5 + $0x8] sm:$0xff]   ;;  %v2964_v62 = vld [vmem:[%s3232_s5 + $0x10] sm:$0xff]  }
  0xf0   :  { %2532 = vmatpush3.bf16.msra.mxu0 %v2940_v63  ;;  %2554 = vmatpush3.bf16.msra.mxu1 %v2941_v0  ;;  %v2965_v63 = vld [vmem:[%s3232_s5 + $0x18] sm:$0xff]   ;;  %v2966_v0 = vld [vmem:[%s3232_s5 + $0x20] sm:$0xff]  }
  0xf1   :  { %2533 = vmatprep.subr.bf16.mxu0 %v2942_v1  ;;  %2555 = vmatprep.subr.bf16.mxu1 %v2943_v2  ;;  %v2967_v1 = vld [vmem:[%s3232_s5 + $0x28] sm:$0xff]   ;;  %v2968_v2 = vld [vmem:[%s3232_s5 + $0x30] sm:$0xff]  }
  0xf4   :  { %2534 = vmatpush3.bf16.msra.mxu0 %v2944_v3  ;;  %2556 = vmatpush3.bf16.msra.mxu1 %v2945_v4  ;;  %v2969_v3 = vld [vmem:[%s3232_s5 + $0x38] sm:$0xff]  }
  0xf5   :  { %2535 = vmatprep.subr.bf16.mxu0 %v2946_v5  ;;  %2557 = vmatprep.subr.bf16.mxu1 %v2947_v54  ;;  %v2480_v54 = vld [vmem:[%s3231_s4] ss:$0 sm:$0xff] }
  0xf8   :  { %2536 = vmatpush3.bf16.msra.mxu0 %v2948_v6  ;;  %2558 = vmatpush3.bf16.msra.mxu1 %v2949_v7 }
  0xf9   :  { %2537 = vmatprep.subr.bf16.mxu0 %v2950_v8  ;;  %2559 = vmatprep.subr.bf16.mxu1 %v2951_v9 }
  0xfc   :  { %2538 = vmatpush3.bf16.msra.mxu0 %v2952_v10  ;;  %2560 = vmatpush3.bf16.msra.mxu1 %v2953_v11 }
  0xfd   :  { %2539 = vmatprep.subr.bf16.mxu0 %v2954_v12  ;;  %2561 = vmatprep.subr.bf16.mxu1 %v2955_v13 }
 0x100   :  { %2540 = vmatpush3.bf16.msra.mxu0 %v2956_v14  ;;  %2562 = vmatpush3.bf16.msra.mxu1 %v2957_v15 }
 0x101   :  { %2541 = vmatprep.subr.bf16.mxu0 %v2958_v16  ;;  %2563 = vmatprep.subr.bf16.mxu1 %v2959_v17 }
 0x104   :  { %2542 = vmatpush3.bf16.msra.mxu0 %v2960_v18  ;;  %2564 = vmatpush3.bf16.msra.mxu1 %v2961_v23 }
 0x105   :  { %2580 = vmatprep.subr.bf16.mxu0 %v3025_v24 }
 0x1ba   :  { %v1505_v34 = vpop.f32.mrb[0].mxu0  ;;  %v1634_v35 = vpop.f32.mrb[0].mxu1 }
 0x1bb   :  { %v1692_v36 = vadd.f32 %v1675_v30, %v1505_v34  ;;  %v1694_v37 = vadd.f32 %v1683_v31, %v1634_v35  ;;  %v1507_v38 = vpop.f32.mrb[1].mxu0  ;;  %v1636_v39 = vpop.f32.mrb[1].mxu1 }
 0x1bc   :  { %v1693_v40 = vadd.f32 %v1679_v32, %v1507_v38  ;;  %v1695_v41 = vadd.f32 %v1687_v33, %v1636_v39  ;;  %v1509_v42 = vpop.f32.mrb[2].mxu0  ;;  %v1638_v43 = vpop.f32.mrb[2].mxu1 }
 0x1bd   :  { %v1696_v44 = vadd.f32 %v1675_v30, %v1509_v42  ;;  %v1698_v45 = vadd.f32 %v1683_v31, %v1638_v43  ;;  %v1511_v19 = vpop.f32.mrb[3].mxu0  ;;  %v1640_v20 = vpop.f32.mrb[3].mxu1  ;;  %v1700_v46 = vmax.f32 %v1692_v36, 0.0  ;;  %v1702_v47 = vmax.f32 %v1694_v37, 0.0  ;;  %v2513_v30 = vld [vmem:[%s3233_s6] ss:$0 sm:$0xff] }
 0x1be   :  { %v1697_v21 = vadd.f32 %v1679_v32, %v1511_v19  ;;  %v1699_v22 = vadd.f32 %v1687_v33, %v1640_v20  ;;  %v1701_v51 = vmax.f32 %v1693_v40, 0.0  ;;  %v1703_v52 = vmax.f32 %v1695_v41, 0.0 }
 0x1bf   :  { %v1704_v49 = vmax.f32 %v1696_v44, 0.0  ;;  %v1706_v50 = vmax.f32 %v1698_v45, 0.0  ;;  %v2188_v36 = vsub.s32 %v2185_v29, %v3092_v48 }
 0x1c0   :  { %v1705_v53 = vmax.f32 %v1697_v21, 0.0  ;;  %v1707_v55 = vmax.f32 %v1699_v22, 0.0 }
 0x1c1   :  { %v1708_v56 = vpack.c.bf16 %v1704_v49, %v1700_v46  ;;  %v1710_v60 = vpack.c.bf16 %v1706_v50, %v1702_v47 }
 0x1c2   :  { %v1709_v57 = vpack.c.bf16 %v1705_v53, %v1701_v51  ;;  %v1711_v58 = vpack.c.bf16 %v1707_v55, %v1703_v52 }
 0x1c4   :  { %2015 = vmatprep.mubr.bf16.mxu0 %v1709_v57  ;;  %2056 = vmatprep.mubr.bf16.mxu1 %v1711_v58 }
 0x1c5   :  { %2016 = vmatmul.mubr.bf16.vlgmr.msra.gmra.mrb[4].mxu0 %v1708_v56  ;;  %2057 = vmatmul.mubr.bf16.vlgmr.msra.gmra.mrb[4].mxu1 %v1710_v60 }
 0x1c6   :  { %2581 = vmatpush3.bf16.msra.mxu0 %v2962_v59  ;;  %2596 = vmatprep.mubr.msk.bf16.mxu0 %vm3026_vm0, %v3025_v24 }
 0x1c7   :  { %2582 = vmatprep.subr.bf16.mxu0 %v3025_v24 }
 0x1ca   :  { %2583 = vmatpush3.bf16.msra.mxu0 %v2963_v61 }
 0x1cb   :  { %2584 = vmatprep.subr.bf16.mxu0 %v3025_v24 }
 0x1ce   :  { %2585 = vmatpush3.bf16.msra.mxu0 %v2964_v62 }
 0x1cf   :  { %2586 = vmatprep.subr.bf16.mxu0 %v3025_v24 }
 0x1d2   :  { %2587 = vmatpush3.bf16.msra.mxu0 %v2965_v63 }
 0x1d3   :  { %2588 = vmatprep.subr.bf16.mxu0 %v3025_v24 }
 0x1d6   :  { %2589 = vmatpush3.bf16.msra.mxu0 %v2966_v0 }
 0x1d7   :  { %2590 = vmatprep.subr.bf16.mxu0 %v3025_v24 }
 0x1da   :  { %2591 = vmatpush3.bf16.msra.mxu0 %v2967_v1 }
 0x1db   :  { %2592 = vmatprep.subr.bf16.mxu0 %v3025_v24 }
 0x1de   :  { %2593 = vmatpush3.bf16.msra.mxu0 %v2968_v2 }
 0x1df   :  { %2594 = vmatprep.subr.bf16.mxu0 %v3025_v24 }
 0x1e2   :  { %2595 = vmatpush3.bf16.msra.mxu0 %v2969_v3 }
 0x298   :  { %v2543_v4 = vpop.f32.mrb[4].mxu0  ;;  %v2565_v5 = vpop.f32.mrb[4].mxu1 }
 0x299   :  { %v2544_v6 = vpop.f32.mrb[5].mxu0  ;;  %v2566_v7 = vpop.f32.mrb[5].mxu1 }
 0x29a   :  { %v2545_v8 = vadd.f32 %v2544_v6, %v2543_v4  ;;  %v2567_v9 = vadd.f32 %v2566_v7, %v2565_v5  ;;  %v2546_v10 = vpop.f32.mrb[6].mxu0  ;;  %v2568_v11 = vpop.f32.mrb[6].mxu1 }
 0x29b   :  { %v2547_v12 = vpop.f32.mrb[7].mxu0  ;;  %v2569_v13 = vpop.f32.mrb[7].mxu1 }
 0x29c   :  { %v2018_v14 = vadd.f32 %v2545_v8, %v2480_v54  ;;  %v2548_v15 = vadd.f32 %v2547_v12, %v2546_v10  ;;  %v2570_v16 = vadd.f32 %v2569_v13, %v2568_v11 }
 0x29e   :  { %v2059_v17 = vadd.f32 %v2567_v9, %v2018_v14  ;;  %v2021_v18 = vadd.f32 %v2548_v15, %v2480_v54 }
 0x2a0   :  { %v2062_v23 = vadd.f32 %v2570_v16, %v2021_v18  ;;  %v2065_v24 = vmax.f32 %v2059_v17, 0.0 }
 0x2a2   :  { %v2066_v25 = vmax.f32 %v2062_v23, 0.0 }
 0x2a4   :  { %v2067_v26 = vpack.c.bf16 %v2066_v25, %v2065_v24 }
 0x2a6   :  { %2597 = vmatmul.mubr.bf16.vlgmr.msra.gmra.mrb[8].mxu0 %v2067_v26 }
 0x379   :  { %v2173_v31 = vpop.f32.mrb[8].mxu0 }
 0x37a   :  { %v2598_v32 = vpop.f32.mrb[9].mxu0  ;;  %v2174_v34 = vadd.f32 %v2513_v30, %v2173_v31 }
 0x37b   :  { %v2176_v33 = vpop.f32.mrb[10].mxu0 }
 0x37c   :  { %v2177_v35 = vadd.f32 %v2513_v30, %v2176_v33  ;;  %v2599_v37 = vpop.f32.mrb[11].mxu0 }
 0x37e   :  { %v2180_v38 = vpack.c.bf16 %v2177_v35, %v2174_v34 }
 0x380   :  { %v2189_v39 = vrot.slane %v2180_v38, %v2188_v36 }
 0x382   :  { %2523 = vst.sshfl [vmem:[#allocation8] sm:$0x1 pattern:$0x73625140] %v2189_v39 }
 0x389   :  { %v2264_v40 = vld [vmem:[#allocation8] sm:$0x1] }
 0x38a   :  { %2265 = vst [vmem:[%s3234_s7] sm:$0x1] %v2264_v40 }
 0x38b   :  { %2282 = vsyncpa [#allocation5], 1 }
 0x38c   :  { %2283 = vsyncpa [#allocation7], 1 }

</bundles_post_ra>
